<compile_context>
chip_gen: v7x
topology: tpu7x:2x2x1
jax: 0.10.0
libtpu: 0.0.40
codegen_flags: <defaults>
</compile_context>

<pallas_src>
import jax
import jax.numpy as jnp
from jax.experimental import pallas as pl
from jax.experimental.pallas import tpu as pltpu


_LANE = 128       # batch tiles are lane multiples -> unmasked lane-dense stores
_MAX_TB = 8192    # per-step batch tile cap: (2H, tb) f32 intermediates plus the
                  # double-buffered x/out tiles stay well under every
                  # generation's scoped-VMEM budget (v5e 16 MiB default,
                  # v7x 64 MiB physical) at this size.


def _fused_net_kernel(x_ref, w1_ref, b1_ref, w2_ref, b2_ref, w3_ref, b3_ref,
                      out_ref):
    """Both ControlNet branches over one (n_in, tb) batch-on-lanes tile.

    out_ref[:n_out, :] = d_u tile (transposed), out_ref[n_out:, :] = s_u tile.
    """
    xT = x_ref[...]                                            # (n_in, tb) f32

    # Layer 1: K = n_in is tiny, but N = tb fills the MXU columns and the MXU
    # is otherwise idle here -> one small dot beats per-k lane broadcasts.
    h1 = jnp.maximum(
        jnp.dot(w1_ref[...], xT, preferred_element_type=jnp.float32)
        + b1_ref[...], 0.0)                                    # (2H, tb)

    # Layers 2 / 3: fused block-diagonal dots covering both branches,
    # f32 accumulation, N = tb lane-dense.
    h2 = jnp.maximum(
        jnp.dot(w2_ref[...], h1, preferred_element_type=jnp.float32)
        + b2_ref[...], 0.0)                                    # (2H, tb)
    out = (jnp.dot(w3_ref[...], h2, preferred_element_type=jnp.float32)
           + b3_ref[...])                                      # (2*n_out, tb)

    # Elementwise gating by the input (requires n_input == n_output).
    # gate = [x ; x] matches the stacked [d ; s] output row-halves.
    n_out = out.shape[0] // 2
    xg = xT[:n_out, :]
    gate = jnp.concatenate([xg, xg], axis=0)                   # sublane concat

    # Single unmasked lane-dense store of the whole (2*n_out, tb) tile.
    out_ref[...] = (out * gate).astype(out_ref.dtype)


def _block_diag(a, b):
    top = jnp.concatenate([a, jnp.zeros((a.shape[0], b.shape[1]), a.dtype)], axis=1)
    bot = jnp.concatenate([jnp.zeros((b.shape[0], a.shape[1]), b.dtype), b], axis=1)
    return jnp.concatenate([top, bot], axis=0)


def _round_up(n, m):
    return ((n + m - 1) // m) * m


def net_forward(x, s_params, d_params):
    """Pallas wrapper for Net.forward.  x: (B, n_in).  Returns (d_u, s_u)."""
    B, n_in = x.shape
    n_out = s_params["w3"].shape[0]
    assert n_in == n_out, "`out * x` gating requires n_input == n_output"
    f32 = jnp.float32

    # ---- fuse the two branches into one weight set (d first, then s) ----
    # Params are stored in PyTorch layout: W (out_features, in_features), b (out,).
    w1 = jnp.concatenate([d_params["w1"], s_params["w1"]], axis=0)       # (2H, n_in)
    b1 = jnp.concatenate([d_params["b1"], s_params["b1"]])[:, None]      # (2H, 1)
    w2 = _block_diag(d_params["w2"], s_params["w2"])                     # (2H, 2H)
    b2 = jnp.concatenate([d_params["b2"], s_params["b2"]])[:, None]      # (2H, 1)
    w3 = _block_diag(d_params["w3"], s_params["w3"])                     # (2*n_out, 2H)
    b3 = jnp.concatenate([d_params["b3"], s_params["b3"]])[:, None]      # (2*n_out, 1)

    # ---- B-derived, lane-dense batch tiling; even step count for v7x's 2 TCs ----
    n_steps = max(2, pl.cdiv(_round_up(B, _LANE), _MAX_TB))
    if n_steps % 2:
        n_steps += 1
    tb = min(_round_up(pl.cdiv(B, n_steps), _LANE), _MAX_TB)
    b_pad = n_steps * tb                                                 # >= B

    xT = x.astype(f32).T                                                 # (n_in, B)
    if b_pad != B:
        xT = jnp.pad(xT, ((0, 0), (0, b_pad - B)))   # zero cols -> gate zeros them

    const = lambda i: (0, 0)          # weights/biases resident: never re-DMA'd

    out = pl.pallas_call(
        _fused_net_kernel,
        out_shape=jax.ShapeDtypeStruct((2 * n_out, b_pad), f32),
        grid_spec=pltpu.PrefetchScalarGridSpec(
            num_scalar_prefetch=0,
            grid=(n_steps,),
            in_specs=[
                pl.BlockSpec((n_in, tb), lambda i: (0, i)),   # x tile (streamed)
                pl.BlockSpec(w1.shape, const),
                pl.BlockSpec(b1.shape, const),
                pl.BlockSpec(w2.shape, const),
                pl.BlockSpec(b2.shape, const),
                pl.BlockSpec(w3.shape, const),
                pl.BlockSpec(b3.shape, const),
            ],
            out_specs=pl.BlockSpec((2 * n_out, tb), lambda i: (0, i)),
        ),
        compiler_params=pltpu.CompilerParams(
            dimension_semantics=("parallel",),      # shards batch over v7x's 2 TCs
            vmem_limit_bytes=32 * 1024 * 1024),     # safe on v5e/v6e/v7x
    )(xT, w1, b1, w2, b2, w3, b3)

    d_u = out[:n_out, :B].T
    s_u = out[n_out:, :B].T
    return d_u, s_u
    # TODO(synk): for the tiny-batch use case (B~8 called many times per step),
    # stack the calls along the batch axis *before* net_forward — launch cost
    # dominates everything in that regime on every TPU generation.


def _init_linear(key, fan_in, fan_out):
    """Mimics torch.nn.Linear init: U(-1/sqrt(fan_in), 1/sqrt(fan_in))."""
    k_w, k_b = jax.random.split(key)
    bound = 1.0 / jnp.sqrt(jnp.float32(fan_in))
    w = jax.random.uniform(k_w, (fan_out, fan_in), jnp.float32, -bound, bound)
    b = jax.random.uniform(k_b, (fan_out,), jnp.float32, -bound, bound)
    return w, b


def init_controlnet(key, n_input, n_hidden, n_output):
    k1, k2, k3 = jax.random.split(key, 3)
    w1, b1 = _init_linear(k1, n_input, n_hidden)
    w2, b2 = _init_linear(k2, n_hidden, n_hidden)
    w3, b3 = _init_linear(k3, n_hidden, n_output)
    return dict(w1=w1, b1=b1, w2=w2, b2=b2, w3=w3, b3=b3)


def _control_ref(x, p):
    h1 = jnp.maximum(x @ p["w1"].T + p["b1"], 0.0)
    h2 = jnp.maximum(h1 @ p["w2"].T + p["b2"], 0.0)
    return (h2 @ p["w3"].T + p["b3"]) * x


if __name__ == "__main__":
    # Small shapes consistent with the module: n_input == n_output so that
    # `out * x` is a plain elementwise product (as in the PyTorch usage).
    B, n_input, n_hidden, n_output = 8, 4, 32, 4

    root = jax.random.PRNGKey(0)
    k_x, k_s, k_d = jax.random.split(root, 3)

    x = jax.random.normal(k_x, (B, n_input), jnp.float32)
    s_params = init_controlnet(k_s, n_input, n_hidden, n_output)
    d_params = init_controlnet(k_d, n_input, n_hidden, n_output)

    d_u, s_u = jax.jit(net_forward)(x, s_params, d_params)
    jax.block_until_ready((d_u, s_u))

    # Cross-check against a plain-JAX reference of the same math.
    d_ref = _control_ref(x, d_params)
    s_ref = _control_ref(x, s_params)
    assert d_u.shape == (B, n_output) and s_u.shape == (B, n_output)
    assert jnp.allclose(d_u, d_ref, atol=1e-5, rtol=1e-5)
    assert jnp.allclose(s_u, s_ref, atol=1e-5, rtol=1e-5)

    print("KERNEL_OK")
</pallas_src>

<mosaic_0001>
module attributes {stable_mosaic.version = 11 : i64} {
  func.func @_fused_net_kernel(%arg0: i32, %arg1: memref<4x128xf32, #tpu.memory_space<vmem>>, %arg2: memref<64x4xf32, #tpu.memory_space<vmem>>, %arg3: memref<64x1xf32, #tpu.memory_space<vmem>>, %arg4: memref<64x64xf32, #tpu.memory_space<vmem>>, %arg5: memref<64x1xf32, #tpu.memory_space<vmem>>, %arg6: memref<8x64xf32, #tpu.memory_space<vmem>>, %arg7: memref<8x1xf32, #tpu.memory_space<vmem>>, %arg8: memref<8x128xf32, #tpu.memory_space<vmem>>) attributes {dimension_semantics = [#tpu.dimension_semantics<parallel>], iteration_bounds = array<i64: 2>, scalar_prefetch = 0 : i64, scratch_operands = 0 : i64, tpu.core_type = #tpu.core_type<tc>, window_params = [{transform_indices = @transform_0, window_bounds = array<i64: 4, 128>}, {pipeline_mode = #tpu.pipeline_mode<synchronous>, transform_indices = @transform_1, window_bounds = array<i64: 64, 4>}, {pipeline_mode = #tpu.pipeline_mode<synchronous>, transform_indices = @transform_2, window_bounds = array<i64: 64, 1>}, {pipeline_mode = #tpu.pipeline_mode<synchronous>, transform_indices = @transform_3, window_bounds = array<i64: 64, 64>}, {pipeline_mode = #tpu.pipeline_mode<synchronous>, transform_indices = @transform_4, window_bounds = array<i64: 64, 1>}, {pipeline_mode = #tpu.pipeline_mode<synchronous>, transform_indices = @transform_5, window_bounds = array<i64: 8, 64>}, {pipeline_mode = #tpu.pipeline_mode<synchronous>, transform_indices = @transform_6, window_bounds = array<i64: 8, 1>}, {transform_indices = @transform_7, window_bounds = array<i64: 8, 128>}]} {
    %c0 = arith.constant 0 : index
    %c0_0 = arith.constant 0 : index
    %0 = vector.load %arg1[%c0, %c0_0] : memref<4x128xf32, #tpu.memory_space<vmem>>, vector<4x128xf32>
    %c0_1 = arith.constant 0 : index
    %c0_2 = arith.constant 0 : index
    %1 = vector.load %arg2[%c0_1, %c0_2] : memref<64x4xf32, #tpu.memory_space<vmem>>, vector<64x4xf32>
    %cst = arith.constant dense<0.000000e+00> : vector<64x128xf32>
    %2 = tpu.matmul %1, %0, %cst {dimension_numbers = #tpu.dot_dimension_numbers<[1], [0], [0], [1], [0, 0, 1, 1], [], []>} : vector<64x4xf32>, vector<4x128xf32>, vector<64x128xf32> -> vector<64x128xf32>
    %c0_3 = arith.constant 0 : index
    %c0_4 = arith.constant 0 : index
    %3 = vector.load %arg3[%c0_3, %c0_4] : memref<64x1xf32, #tpu.memory_space<vmem>>, vector<64x1xf32>
    %4 = vector.broadcast %3 : vector<64x1xf32> to vector<64x128xf32>
    %5 = arith.addf %2, %4 : vector<64x128xf32>
    %cst_5 = arith.constant 0.000000e+00 : f32
    %6 = vector.broadcast %cst_5 : f32 to vector<64x128xf32>
    %7 = arith.maximumf %5, %6 : vector<64x128xf32>
    %c0_6 = arith.constant 0 : index
    %c0_7 = arith.constant 0 : index
    %8 = vector.load %arg4[%c0_6, %c0_7] : memref<64x64xf32, #tpu.memory_space<vmem>>, vector<64x64xf32>
    %cst_8 = arith.constant dense<0.000000e+00> : vector<64x128xf32>
    %9 = tpu.matmul %8, %7, %cst_8 {dimension_numbers = #tpu.dot_dimension_numbers<[1], [0], [0], [1], [0, 0, 1, 1], [], []>} : vector<64x64xf32>, vector<64x128xf32>, vector<64x128xf32> -> vector<64x128xf32>
    %c0_9 = arith.constant 0 : index
    %c0_10 = arith.constant 0 : index
    %10 = vector.load %arg5[%c0_9, %c0_10] : memref<64x1xf32, #tpu.memory_space<vmem>>, vector<64x1xf32>
    %11 = vector.broadcast %10 : vector<64x1xf32> to vector<64x128xf32>
    %12 = arith.addf %9, %11 : vector<64x128xf32>
    %cst_11 = arith.constant 0.000000e+00 : f32
    %13 = vector.broadcast %cst_11 : f32 to vector<64x128xf32>
    %14 = arith.maximumf %12, %13 : vector<64x128xf32>
    %c0_12 = arith.constant 0 : index
    %c0_13 = arith.constant 0 : index
    %15 = vector.load %arg6[%c0_12, %c0_13] : memref<8x64xf32, #tpu.memory_space<vmem>>, vector<8x64xf32>
    %cst_14 = arith.constant dense<0.000000e+00> : vector<8x128xf32>
    %16 = tpu.matmul %15, %14, %cst_14 {dimension_numbers = #tpu.dot_dimension_numbers<[1], [0], [0], [1], [0, 0, 1, 1], [], []>} : vector<8x64xf32>, vector<64x128xf32>, vector<8x128xf32> -> vector<8x128xf32>
    %c0_15 = arith.constant 0 : index
    %c0_16 = arith.constant 0 : index
    %17 = vector.load %arg7[%c0_15, %c0_16] : memref<8x1xf32, #tpu.memory_space<vmem>>, vector<8x1xf32>
    %18 = vector.broadcast %17 : vector<8x1xf32> to vector<8x128xf32>
    %19 = arith.addf %16, %18 : vector<8x128xf32>
    %20 = tpu.concatenate %0, %0 in 0 : vector<4x128xf32>, vector<4x128xf32> -> vector<8x128xf32>
    %21 = arith.mulf %19, %20 : vector<8x128xf32>
    %c0_17 = arith.constant 0 : index
    %c0_18 = arith.constant 0 : index
    %22 = vector.load %arg8[%c0_17, %c0_18] : memref<8x128xf32, #tpu.memory_space<vmem>>, vector<8x128xf32>
    tpu.vector_store %arg8[%c0_17, %c0_18], %21 {strides = array<i32>} : memref<8x128xf32, #tpu.memory_space<vmem>>, vector<8x128xf32>,
    return
  }
  func.func @transform_0(%arg0: i32) -> (i32, i32) {
    %c0_i32 = arith.constant 0 : i32
    %c0_i32_0 = arith.constant 0 : i32
    return %c0_i32, %arg0 : i32, i32
  }
  func.func @transform_1(%arg0: i32) -> (i32, i32) {
    %c0_i32 = arith.constant 0 : i32
    %c0_i32_0 = arith.constant 0 : i32
    %c0_i32_1 = arith.constant 0 : i32
    return %c0_i32, %c0_i32_0 : i32, i32
  }
  func.func @transform_2(%arg0: i32) -> (i32, i32) {
    %c0_i32 = arith.constant 0 : i32
    %c0_i32_0 = arith.constant 0 : i32
    %c0_i32_1 = arith.constant 0 : i32
    return %c0_i32, %c0_i32_0 : i32, i32
  }
  func.func @transform_3(%arg0: i32) -> (i32, i32) {
    %c0_i32 = arith.constant 0 : i32
    %c0_i32_0 = arith.constant 0 : i32
    %c0_i32_1 = arith.constant 0 : i32
    return %c0_i32, %c0_i32_0 : i32, i32
  }
  func.func @transform_4(%arg0: i32) -> (i32, i32) {
    %c0_i32 = arith.constant 0 : i32
    %c0_i32_0 = arith.constant 0 : i32
    %c0_i32_1 = arith.constant 0 : i32
    return %c0_i32, %c0_i32_0 : i32, i32
  }
  func.func @transform_5(%arg0: i32) -> (i32, i32) {
    %c0_i32 = arith.constant 0 : i32
    %c0_i32_0 = arith.constant 0 : i32
    %c0_i32_1 = arith.constant 0 : i32
    return %c0_i32, %c0_i32_0 : i32, i32
  }
  func.func @transform_6(%arg0: i32) -> (i32, i32) {
    %c0_i32 = arith.constant 0 : i32
    %c0_i32_0 = arith.constant 0 : i32
    %c0_i32_1 = arith.constant 0 : i32
    return %c0_i32, %c0_i32_0 : i32, i32
  }
  func.func @transform_7(%arg0: i32) -> (i32, i32) {
    %c0_i32 = arith.constant 0 : i32
    %c0_i32_0 = arith.constant 0 : i32
    return %c0_i32, %arg0 : i32, i32
  }
}

</mosaic_0001>

<bundles_post_ra>
// kernel: net_forward.1
= control target key start
LH: loop header
LB: loop body
LE: loop exit
PB: predicated region body
PF: predicated region fallthrough
CT: control target
= control target key end

     0   :  { %s1021_s24 = smov 0   ;;  %s1170_s0 = inlined_call_operand.vmem [shape: f32[4,256], index: 0, kind: input, shape index: {}]   ;;  %s1171_s1 = inlined_call_operand.vmem [shape: f32[64,4], index: 1, kind: input, shape index: {}]   ;;  %s1172_s2 = inlined_call_operand.vmem [shape: f32[64,1], index: 2, kind: input, shape index: {}]   ;;  %s1173_s3 = inlined_call_operand.vmem [shape: f32[64,64], index: 3, kind: input, shape index: {}]   ;;  %s1174_s4 = inlined_call_operand.vmem [shape: f32[64,1], index: 4, kind: input, shape index: {}]   ;;  %s1175_s5 = inlined_call_operand.vmem [shape: f32[8,64], index: 5, kind: input, shape index: {}]   ;;  %s1176_s6 = inlined_call_operand.vmem [shape: f32[8,1], index: 6, kind: input, shape index: {}]   ;;  %s1177_s7 = inlined_call_operand.vmem [shape: f32[8,256], index: 7, kind: output, shape index: {}]  }
   0x1 LB: > { %s805_s25 = sadd.s32 4294967295, %s975_s24   ;;  %p809_p0 = scmp.ge.s32.totalorder %s975_s24, 1  ;;  %s975_s24 = sphi %s1021_s24, %s17_s24  }
   0x2   : > { %p236_p1 = scmp.lt.s32.totalorder %s975_s24, 3 }
   0x4   : > { %p237_p2 = pnand %p809_p0, %p236_p1 }
   0x5   : > { %p266_p3 = scmp.lt.s32.totalorder (!%p237_p2), %s805_s25, 1  ;;  %v275_v0 = vld [vmem:[%s1171_s1] sm:$0xff] (!%p237_p2)  ;;  %vm331_vm0 = vcmask (!%p237_p2), 31744   ;;  %v977_v1 = vmov (!%p237_p2), 0   ;;  %v285_v3 = vld [vmem:[%s1172_s2 + $0x10] sm:$0xff] (!%p237_p2)  ;;  %vm356_vm1 = vcmask (!%p237_p2), 1043456  }
   0x6   : > { %240 = sbr.rel (%p237_p2) target bundleno = 705 (0x2c1), region = 48  ;;  %868 = vmatprep.mubr.msk.f32.mxu0 (!%p237_p2), %vm331_vm0, %v275_v0  ;;  %967 = vset.pattern.permute.xlu0 (!%p237_p2), %v977_v1  ;;  %v283_v2 = vld [vmem:[%s1172_s2] sm:$0xff] (!%p237_p2)  ;;  %v284_v4 = vld [vmem:[%s1172_s2 + $0x8] sm:$0xff] (!%p237_p2)  ;;  %v286_v5 = vld [vmem:[%s1172_s2 + $0x18] sm:$0xff] (!%p237_p2)  ;;  %vm529_vm2 = vcmask (!%p237_p2), 523264   ;;  %vm979_vm3 = vmmov (!%p237_p2), 0  }
   0x7   : > { %968 = vset.pattern.permute.xlu1 (!%p237_p2), %v977_v1  ;;  %293 = vperm.xlu0 (!%p237_p2), %967, %v283_v2   ;;  %v276_v7 = vld [vmem:[%s1171_s1 + $0x8] sm:$0xff] (!%p237_p2)  ;;  %v277_v8 = vld [vmem:[%s1171_s1 + $0x10] sm:$0xff] (!%p237_p2)  ;;  %v287_v9 = vld [vmem:[%s1172_s2 + $0x20] sm:$0xff] (!%p237_p2) }
   0x8   : > { %303 = vperm.xlu1 (!%p237_p2), %968, %v285_v3   ;;  %v288_v10 = vld [vmem:[%s1172_s2 + $0x28] sm:$0xff] (!%p237_p2)  ;;  %v278_v11 = vld [vmem:[%s1171_s1 + $0x18] sm:$0xff] (!%p237_p2)  ;;  %v279_v12 = vld [vmem:[%s1171_s1 + $0x20] sm:$0xff] (!%p237_p2) }
   0x9   : > { %v289_v13 = vld [vmem:[%s1172_s2 + $0x30] sm:$0xff] (!%p237_p2)  ;;  %v290_v14 = vld [vmem:[%s1172_s2 + $0x38] sm:$0xff] (!%p237_p2)  ;;  %v280_v15 = vld [vmem:[%s1171_s1 + $0x28] sm:$0xff] (!%p237_p2) }
   0xa   : > { %v281_v16 = vld [vmem:[%s1171_s1 + $0x30] sm:$0xff] (!%p237_p2)  ;;  %v481_v17 = vld [vmem:[%s1174_s4] sm:$0xff] (!%p237_p2)  ;;  %v482_v18 = vld [vmem:[%s1174_s4 + $0x8] sm:$0xff] (!%p237_p2) }
   0xb   : > { %298 = vperm.xlu0 (!%p237_p2), %967, %v284_v4   ;;  %v282_v19 = vld [vmem:[%s1171_s1 + $0x38] sm:$0xff] (!%p237_p2)  ;;  %v483_v20 = vld [vmem:[%s1174_s4 + $0x10] sm:$0xff] (!%p237_p2)  ;;  %v485_v22 = vld [vmem:[%s1174_s4 + $0x20] sm:$0xff] (!%p237_p2) }
   0xc   : > { %308 = vperm.xlu1 (!%p237_p2), %968, %v286_v5   ;;  %v484_v21 = vld [vmem:[%s1174_s4 + $0x18] sm:$0xff] (!%p237_p2)  ;;  %v486_v23 = vld [vmem:[%s1174_s4 + $0x28] sm:$0xff] (!%p237_p2)  ;;  %v487_v24 = vld [vmem:[%s1174_s4 + $0x30] sm:$0xff] (!%p237_p2) }
   0xd   : > { %s1179_s25 = smov (!%p266_p3, %s805_s25), 1  ;;  %v488_v25 = vld [vmem:[%s1174_s4 + $0x38] sm:$0xff]  ;;  %v668_v26 = vld [vmem:[%s1176_s6] sm:$0xff]  ;;  %v474_v0 = vld [vmem:[%s1173_s3 + $0x8] sm:$0xff] }
   0xe   : > { %s810_s9 = sshll.u32 %s1179_s25, 2  ;;  %v473_v27 = vld [vmem:[%s1173_s3] sm:$0xff]  ;;  %v475_v1 = vld [vmem:[%s1173_s3 + $0x10] sm:$0xff]  ;;  %v476_v2 = vld [vmem:[%s1173_s3 + $0x18] sm:$0xff]  ;;  %s811_s12 = sshll.u32 %s1179_s25, 3 }
   0xf   : > { %s269_s14 = scalar_lea.vmem %s1170_s0, %s810_s9  ;;  %313 = vperm.xlu0 %967, %v287_v9   ;;  %896 = vmatprep.mubr.msk.f32.mxu1 %vm529_vm2, %v473_v27  ;;  %v477_v3 = vld [vmem:[%s1173_s3 + $0x20] sm:$0xff]  ;;  %v478_v4 = vld [vmem:[%s1173_s3 + $0x28] sm:$0xff]  ;;  %v479_v5 = vld [vmem:[%s1173_s3 + $0x30] sm:$0xff]  ;;  %v980_v9 = vmov 0.0   ;;  %s273_s15 = scalar_lea.vmem %s1177_s7, %s811_s12 }
  0x10   : > { %v1051_v6 = vld [vmem:[%s269_s14] sm:$0xf]  ;;  %318 = vperm.xlu1 %968, %v288_v10  }
  0x11   : > { %866 = vmatprep.subr.msk.mxu0 %vm356_vm1, %v1051_v6 }
  0x12   : > { %867 = vmatpush3.msk.msra.mxu0 %vm356_vm1, %v1051_v6 }
  0x13   : > { %869 = vmatmul.mubr.msk.f32.vlgmr.msra.gmra.mrb[0].mxu0 %vm331_vm0, %v276_v7  ;;  %323 = vperm.xlu0 %967, %v289_v13   ;;  %v480_v7 = vld [vmem:[%s1173_s3 + $0x38] sm:$0xff] }
  0x14   : > { %871 = vmatprep.mubr.msk.f32.mxu0 %vm331_vm0, %v277_v8  ;;  %328 = vperm.xlu1 %968, %v290_v14   ;;  %v978_v8 = vmov 0.0|0.0  }
  0x15   : > { %943 = vmatprep.subr.bf16.mxu0 %v978_v8 }
  0x17   : > { %872 = vmatmul.mubr.msk.f32.gmra.mrb[2].mxu0 %vm331_vm0, %v278_v11  ;;  %491 = vperm.xlu0 %967, %v481_v17  }
  0x18   : > { %874 = vmatprep.mubr.msk.f32.mxu0 %vm331_vm0, %v279_v12  ;;  %496 = vperm.xlu1 %968, %v482_v18  }
  0x1b   : > { %875 = vmatmul.mubr.msk.f32.gmra.mrb[4].mxu0 %vm331_vm0, %v280_v15  ;;  %501 = vperm.xlu0 %967, %v483_v20  }
  0x1c   : > { %877 = vmatprep.mubr.msk.f32.mxu0 %vm331_vm0, %v281_v16  ;;  %506 = vperm.xlu1 %968, %v484_v21  }
  0x1f   : > { %878 = vmatmul.mubr.msk.f32.gmra.mrb[6].mxu0 %vm331_vm0, %v282_v19  ;;  %511 = vperm.xlu0 %967, %v485_v22  }
  0x20   : > { %516 = vperm.xlu1 %968, %v486_v23   ;;  %924 = vmatprep.mubr.msk.f32.mxu0 %vm979_vm3, %v980_v9 }
  0x23   : > { %521 = vperm.xlu0 %967, %v487_v24  }
  0x24   : > { %526 = vperm.xlu1 %968, %v488_v25  }
  0x27   : > { %671 = vperm.xlu0 %967, %v668_v26  }
  0x86   : > { %v294_v28 = vpop.permute.xlu0 %293 }
  0x87   : > { %v304_v29 = vpop.permute.xlu1 %303 }
  0x8a   : > { %v299_v30 = vpop.permute.xlu0 %298 }
  0x8b   : > { %v309_v31 = vpop.permute.xlu1 %308 }
  0x8e   : > { %v314_v44 = vpop.permute.xlu0 %313 }
  0x8f   : > { %v319_v41 = vpop.permute.xlu1 %318 }
  0x92   : > { %v324_v56 = vpop.permute.xlu0 %323 }
  0x93   : > { %v329_v53 = vpop.permute.xlu1 %328 }
  0x96   : > { %v492_v11 = vpop.permute.xlu0 %491 }
  0x97   : > { %v497_v10 = vpop.permute.xlu1 %496 }
  0x9a   : > { %v502_v14 = vpop.permute.xlu0 %501 }
  0x9b   : > { %v507_v12 = vpop.permute.xlu1 %506 }
  0x9e   : > { %v512_v26 = vpop.permute.xlu0 %511 }
  0x9f   : > { %v517_v23 = vpop.permute.xlu1 %516 }
  0xe6   : > { %v870_v32 = vpop.f32.mrb[0].mxu0 }
  0xe7   : > { %v432_v33 = vadd.f32 %v870_v32, %v299_v30  ;;  %v426_v34 = vpop.f32.mrb[1].mxu0 }
  0xe8   : > { %v427_v35 = vadd.f32 %v426_v34, %v294_v28 }
  0xe9   : > { %v466_v36 = vmax.f32 %v432_v33, 0.0 }
  0xea   : > { %v465_v37 = vmax.f32 %v427_v35, 0.0  ;;  %v873_v38 = vpop.f32.mrb[2].mxu0  ;;  %v527_v35 = vpop.permute.xlu1 %526 }
  0xeb   : > { %v442_v39 = vadd.f32 %v873_v38, %v309_v31  ;;  %v436_v40 = vpop.f32.mrb[3].mxu0  ;;  %v522_v38 = vpop.permute.xlu0 %521 }
  0xec   : > { %v437_v42 = vadd.f32 %v436_v40, %v304_v29  ;;  %v927_v43 = vpack.c.bf16 %v466_v36, %v465_v37 }
  0xed   : > { %v468_v45 = vmax.f32 %v442_v39, 0.0 }
  0xee   : > { %v467_v46 = vmax.f32 %v437_v42, 0.0  ;;  %v876_v47 = vpop.f32.mrb[4].mxu0  ;;  %928 = vmatprep.subr.bf16.mxu1 %v927_v43 }
  0xef   : > { %v452_v48 = vadd.f32 %v876_v47, %v319_v41  ;;  %v446_v49 = vpop.f32.mrb[5].mxu0  ;;  %930 = vmatpush3.bf16.msra.mxu1 %v927_v43  ;;  %v747_v47 = vrot.slane %v1051_v6, 4 }
  0xf0   : > { %v931_v50 = vpack.c.bf16 %v468_v45, %v467_v46  ;;  %v447_v51 = vadd.f32 %v446_v49, %v314_v44  ;;  %v667_v46 = vld [vmem:[%s1175_s5] sm:$0xff] }
  0xf1   : > { %v470_v52 = vmax.f32 %v452_v48, 0.0  ;;  %v672_v48 = vpop.permute.xlu0 %671 }
  0xf2   : > { %v469_v54 = vmax.f32 %v447_v51, 0.0  ;;  %v879_v55 = vpop.f32.mrb[6].mxu0  ;;  %932 = vmatprep.subr.bf16.mxu1 %v931_v50 }
  0xf3   : > { %v462_v57 = vadd.f32 %v879_v55, %v329_v53  ;;  %v456_v58 = vpop.f32.mrb[7].mxu0  ;;  %934 = vmatpush3.bf16.msra.mxu1 %v931_v50  ;;  %v749_v50 = vsel %vm356_vm1, %v1051_v6, %v747_v47 }
  0xf4   : > { %v935_v59 = vpack.c.bf16 %v470_v52, %v469_v54  ;;  %v457_v60 = vadd.f32 %v456_v58, %v324_v56 }
  0xf5   : > { %v472_v61 = vmax.f32 %v462_v57, 0.0 }
  0xf6   : > { %v471_v62 = vmax.f32 %v457_v60, 0.0  ;;  %936 = vmatprep.subr.bf16.mxu1 %v935_v59 }
  0xf7   : > { %938 = vmatpush3.bf16.msra.mxu1 %v935_v59 }
  0xf8   : > { %v939_v63 = vpack.c.bf16 %v472_v61, %v471_v62 }
  0xfa   : > { %940 = vmatprep.subr.bf16.mxu1 %v939_v63 }
  0xfb   : > { %942 = vmatpush3.bf16.msra.mxu1 %v939_v63 }
  0xfe   : > { %897 = vmatmul.mubr.msk.f32.vlgmr.msra.gmra.mrb[0].mxu1 %vm529_vm2, %v474_v0 }
  0xff   : > { %899 = vmatprep.mubr.msk.f32.mxu1 %vm529_vm2, %v475_v1 }
 0x102   : > { %900 = vmatmul.mubr.msk.f32.gmra.mrb[2].mxu1 %vm529_vm2, %v476_v2 }
 0x103   : > { %902 = vmatprep.mubr.msk.f32.mxu1 %vm529_vm2, %v477_v3 }
 0x106   : > { %903 = vmatmul.mubr.msk.f32.gmra.mrb[4].mxu1 %vm529_vm2, %v478_v4 }
 0x107   : > { %905 = vmatprep.mubr.msk.f32.mxu1 %vm529_vm2, %v479_v5 }
 0x10a   : > { %906 = vmatmul.mubr.msk.f32.gmra.mrb[6].mxu1 %vm529_vm2, %v480_v7 }
 0x1d1   : > { %v898_v13 = vpop.f32.mrb[0].mxu1 }
 0x1d2   : > { %v626_v15 = vadd.f32 %v898_v13, %v497_v10  ;;  %v620_v16 = vpop.f32.mrb[1].mxu1 }
 0x1d3   : > { %v621_v17 = vadd.f32 %v620_v16, %v492_v11 }
 0x1d4   : > { %v660_v18 = vmax.f32 %v626_v15, 0.0 }
 0x1d5   : > { %v659_v19 = vmax.f32 %v621_v17, 0.0  ;;  %v901_v20 = vpop.f32.mrb[2].mxu1 }
 0x1d6   : > { %v636_v21 = vadd.f32 %v901_v20, %v507_v12  ;;  %v630_v22 = vpop.f32.mrb[3].mxu1 }
 0x1d7   : > { %v944_v24 = vpack.c.bf16 %v660_v18, %v659_v19  ;;  %v631_v25 = vadd.f32 %v630_v22, %v502_v14 }
 0x1d8   : > { %v662_v27 = vmax.f32 %v636_v21, 0.0 }
 0x1d9   : > { %v661_v28 = vmax.f32 %v631_v25, 0.0  ;;  %v904_v29 = vpop.f32.mrb[4].mxu1  ;;  %945 = vmatpush3.bf16.msra.mxu0 %v944_v24 }
 0x1da   : > { %v646_v30 = vadd.f32 %v904_v29, %v517_v23  ;;  %v640_v31 = vpop.f32.mrb[5].mxu1  ;;  %946 = vmatprep.subr.bf16.mxu0 %v978_v8 }
 0x1db   : > { %v947_v32 = vpack.c.bf16 %v662_v27, %v661_v28  ;;  %v641_v33 = vadd.f32 %v640_v31, %v512_v26 }
 0x1dc   : > { %v664_v34 = vmax.f32 %v646_v30, 0.0 }
 0x1dd   : > { %v663_v36 = vmax.f32 %v641_v33, 0.0  ;;  %v907_v37 = vpop.f32.mrb[6].mxu1  ;;  %948 = vmatpush3.bf16.msra.mxu0 %v947_v32 }
 0x1de   : > { %v656_v39 = vadd.f32 %v907_v37, %v527_v35  ;;  %v650_v40 = vpop.f32.mrb[7].mxu1  ;;  %949 = vmatprep.subr.bf16.mxu0 %v978_v8 }
 0x1df   : > { %v950_v41 = vpack.c.bf16 %v664_v34, %v663_v36  ;;  %v651_v42 = vadd.f32 %v650_v40, %v522_v38 }
 0x1e0   : > { %v666_v43 = vmax.f32 %v656_v39, 0.0 }
 0x1e1   : > { %v665_v44 = vmax.f32 %v651_v42, 0.0  ;;  %951 = vmatpush3.bf16.msra.mxu0 %v950_v41 }
 0x1e2   : > { %952 = vmatprep.subr.bf16.mxu0 %v978_v8 }
 0x1e3   : > { %v953_v45 = vpack.c.bf16 %v666_v43, %v665_v44 }
 0x1e5   : > { %954 = vmatpush3.bf16.msra.mxu0 %v953_v45 }
 0x1e8   : > { %925 = vmatmul.mubr.msk.f32.vlgmr.msra.gmra.mrb[8].mxu0 %vm529_vm2, %v667_v46 }
 0x2bb   : > { %v743_v49 = vpop.f32.mrb[8].mxu0 }
 0x2bc   : > { %v744_v51 = vadd.f32 %v743_v49, %v672_v48  ;;  %v926_v52 = vpop.f32.mrb[9].mxu0 }
 0x2be   : > { %v750_v53 = vmul.f32 %v749_v50, %v744_v51 }
 0x2c0   : > { %751 = vst [vmem:[%s273_s15] sm:$0xff] %v750_v53 }
 0x2c1 PF: > { %s17_s24 = sadd.s32 1, %s975_s24  }
 0x2c2   : > { %p14_p4 = scmp.ge.s32.totalorder %s17_s24, 4  }
 0x2c4   :  { %16 = sbr.rel (!%p14_p4) target bundleno = 1 (0x1), region = 78 }

</bundles_post_ra>
